<compile_context>
chip_gen: v7x
topology: tpu7x:2x2x1
jax: 0.10.0
libtpu: 0.0.40
codegen_flags: <defaults>
</compile_context>

<pallas_src>
import jax
import jax.numpy as jnp
import numpy as np
from jax.experimental import pallas as pl
from jax.experimental.pallas import tpu as pltpu


# ----------------------------------------------------------------------------
# Pallas kernel.  One grid step processes TB batch elements, all folded into
# the lane axis.  Activations are feature-major: [features, TB*nodes/edges].
# ----------------------------------------------------------------------------
def _mlp_decoder_kernel(
    x_ref,            # [1, n_in, TB*N]                bf16  node features (lane-folded)
    relw_ref,         # [1, ET*msg_out, TB*E]          f32   rel_types, rows pre-expanded
    rel_send_bd_ref,  # [TB*N, TB*E]                   bf16  block-diag rel_send^T
    rel_recv_bd_ref,  # [TB*N, TB*E]                   bf16  block-diag rel_rec^T
    rel_agg_bd_ref,   # [TB*E, TB*N]                   bf16  block-diag rel_rec
    w1s_ref,          # [ET*msg_hid, n_in]             bf16  msg_fc1 sender half (fused)
    w1r_ref,          # [ET*msg_hid, n_in]             bf16  msg_fc1 receiver half (fused)
    b1_ref,           # [ET*msg_hid, 1]                f32
    w2bd_ref,         # [ET*msg_out, ET*msg_hid]       bf16  block-diag msg_fc2
    b2_ref,           # [ET*msg_out, 1]                f32
    sum_ref,          # [msg_out, ET*msg_out]          bf16  edge-type collapse matrix
    wo1x_ref,         # [n_hid, n_in]                  bf16  out_fc1 x half
    wo1m_ref,         # [n_hid, msg_out]               bf16  out_fc1 message half
    bo1_ref,          # [n_hid, 1]                     f32
    wo2_ref,          # [n_hid, n_hid]                 bf16
    bo2_ref,          # [n_hid, 1]                     f32
    wo3_ref,          # [n_out, n_hid]                 bf16
    bo3_ref,          # [n_out, 1]                     f32
    o_ref,            # [1, n_out, TB*N]               f32
):
    f32 = jnp.float32
    bf16 = jnp.bfloat16

    x = x_ref[0]                                                      # [n_in, TB*N] bf16

    # --- node2edge gather: block-diagonal one-hot matmuls (exact in bf16) ---
    senders = jnp.dot(x, rel_send_bd_ref[...],
                      preferred_element_type=f32).astype(bf16)        # [n_in, TB*E]
    receivers = jnp.dot(x, rel_recv_bd_ref[...],
                        preferred_element_type=f32).astype(bf16)      # [n_in, TB*E]

    # --- msg_fc1, fused over edge types (split sender/receiver halves) ------
    h = (jnp.dot(w1s_ref[...], senders, preferred_element_type=f32)
         + jnp.dot(w1r_ref[...], receivers, preferred_element_type=f32)
         + b1_ref[...])
    h = jnp.maximum(h, 0.0)                                           # [ET*msg_hid, TB*E] f32

    # --- msg_fc2, fused over edge types via a block-diagonal weight ---------
    m = jnp.dot(w2bd_ref[...], h.astype(bf16),
                preferred_element_type=f32) + b2_ref[...]
    m = jnp.maximum(m, 0.0)                                           # [ET*msg_out, TB*E] f32

    # Weight each edge type's messages by rel_types (rows pre-expanded in the
    # wrapper), then collapse the edge-type groups with a constant summing
    # matmul (replaces the per-type loop + zeros accumulator).
    weighted = (m * relw_ref[0]).astype(bf16)                         # [ET*msg_out, TB*E]
    all_msgs = jnp.dot(sum_ref[...], weighted,
                       preferred_element_type=f32)                    # [msg_out, TB*E]

    # --- edge2node aggregation (block-diagonal); forward() does NOT /N ------
    agg = jnp.dot(all_msgs.astype(bf16), rel_agg_bd_ref[...],
                  preferred_element_type=f32)                         # [msg_out, TB*N]

    # --- output MLP over the full lane width TB*N (split out_fc1, no concat);
    #     dropout omitted (eval semantics) -----------------------------------
    h1 = (jnp.dot(wo1x_ref[...], x, preferred_element_type=f32)
          + jnp.dot(wo1m_ref[...], agg.astype(bf16), preferred_element_type=f32)
          + bo1_ref[...])
    h1 = jnp.maximum(h1, 0.0)                                         # [n_hid, TB*N]
    h2 = jnp.dot(wo2_ref[...], h1.astype(bf16),
                 preferred_element_type=f32) + bo2_ref[...]
    h2 = jnp.maximum(h2, 0.0)                                         # [n_hid, TB*N]
    pred = jnp.dot(wo3_ref[...], h2.astype(bf16),
                   preferred_element_type=f32) + bo3_ref[...]         # [n_out, TB*N]

    o_ref[0] = pred                                                   # lane-dense store


def mlp_decoder_forward(inputs, rel_rec, rel_send, rel_types, params,
                        *, edge_types, msg_out, n_out, batch_tile=None):
    """inputs: [B, n_in, N]; rel_rec/rel_send: [E, N]; rel_types: [B, E, ET].

    Returns [B, n_out, N] (matches PyTorch MLPDecoder.forward output layout)."""
    B, n_in, N = inputs.shape
    E = rel_rec.shape[0]
    (mw1, mb1, mw2, mb2, ow1, ob1, ow2, ob2, ow3, ob3) = params
    msg_hid = mw1.shape[-1]
    n_hid = ow1.shape[-1]

    f32 = jnp.float32
    bf16 = jnp.bfloat16

    # ---- batch tiling: single grid step on 1-TC chips, 2 steps on v7x ------
    if batch_tile is None:
        two_cores = False
        try:
            kind = jax.devices()[0].device_kind.lower()
            two_cores = ("v7" in kind) or ("7x" in kind)
        except Exception:
            two_cores = False
        batch_tile = max(1, pl.cdiv(B, 2)) if (two_cores and B > 1) else B
    TB = int(batch_tile)
    pad = (-B) % TB
    Bp = B + pad
    steps = Bp // TB

    # ---- one-time wrapper-side re-layouts (constant under jit) -------------
    x = inputs
    rt = rel_types
    if pad:
        x = jnp.pad(x, ((0, pad), (0, 0), (0, 0)))
        rt = jnp.pad(rt, ((0, pad), (0, 0), (0, 0)))

    # x: [Bp, n_in, N] -> [steps, n_in, TB*N]  (batch folded into lanes), bf16.
    x_steps = jnp.transpose(x.reshape(steps, TB, n_in, N), (0, 2, 1, 3))
    x_steps = x_steps.reshape(steps, n_in, TB * N).astype(bf16)

    # rel_types: [Bp, E, ET] -> each type row repeated msg_out times (matches
    # the fused msg_fc2 row layout) -> [steps, ET*msg_out, TB*E], f32.
    rt = jnp.transpose(rt, (0, 2, 1))                                  # [Bp, ET, E]
    rt = jnp.repeat(rt, msg_out, axis=1)                              # [Bp, ET*msg_out, E]
    relw = jnp.transpose(rt.reshape(steps, TB, edge_types * msg_out, E), (0, 2, 1, 3))
    relw = relw.reshape(steps, edge_types * msg_out, TB * E).astype(f32)

    # Block-diagonal one-hot relation matrices (exact in bf16): make the
    # per-batch node2edge / edge2node ops single lane-dense matmuls.
    eye_tb = jnp.eye(TB, dtype=f32)
    rel_send_bd = jnp.kron(eye_tb, jnp.transpose(rel_send, (1, 0))).astype(bf16)  # [TB*N, TB*E]
    rel_recv_bd = jnp.kron(eye_tb, jnp.transpose(rel_rec, (1, 0))).astype(bf16)   # [TB*N, TB*E]
    rel_agg_bd = jnp.kron(eye_tb, rel_rec).astype(bf16)                           # [TB*E, TB*N]

    # msg_fc1: split sender/receiver halves, fuse edge types => one matmul.
    w1s = jnp.transpose(mw1[:, :n_in, :], (0, 2, 1)).reshape(edge_types * msg_hid, n_in).astype(bf16)
    w1r = jnp.transpose(mw1[:, n_in:, :], (0, 2, 1)).reshape(edge_types * msg_hid, n_in).astype(bf16)
    b1 = mb1.reshape(edge_types * msg_hid, 1).astype(f32)

    # msg_fc2: block-diagonal over edge types + constant collapse matrix.
    w2_t = jnp.transpose(mw2, (0, 2, 1))                               # [ET, msg_out, msg_hid]
    eye_et = jnp.eye(edge_types, dtype=f32)
    w2bd = jnp.einsum('ts,toh->tosh', eye_et, w2_t).reshape(
        edge_types * msg_out, edge_types * msg_hid).astype(bf16)
    b2 = mb2.reshape(edge_types * msg_out, 1).astype(f32)
    sum_mat = jnp.tile(jnp.eye(msg_out, dtype=f32), (1, edge_types)).astype(bf16)

    # Output MLP: split out_fc1 into x / message halves (removes the concat).
    wo1x = jnp.transpose(ow1[:n_in], (1, 0)).astype(bf16)              # [n_hid, n_in]
    wo1m = jnp.transpose(ow1[n_in:], (1, 0)).astype(bf16)              # [n_hid, msg_out]
    bo1 = ob1.reshape(n_hid, 1).astype(f32)
    wo2 = jnp.transpose(ow2, (1, 0)).astype(bf16)
    bo2 = ob2.reshape(n_hid, 1).astype(f32)
    wo3 = jnp.transpose(ow3, (1, 0)).astype(bf16)
    bo3 = ob3.reshape(n_out, 1).astype(f32)

    # ---- block specs --------------------------------------------------------
    step_map3 = lambda b: (b, 0, 0)       # batch-varying (leading step dim)
    fixed = lambda b: (0, 0)              # grid-invariant: no re-DMA across steps

    operands = [
        (x_steps,     pl.BlockSpec((1, n_in, TB * N), step_map3)),
        (relw,        pl.BlockSpec((1, edge_types * msg_out, TB * E), step_map3)),
        (rel_send_bd, pl.BlockSpec((TB * N, TB * E), fixed)),
        (rel_recv_bd, pl.BlockSpec((TB * N, TB * E), fixed)),
        (rel_agg_bd,  pl.BlockSpec((TB * E, TB * N), fixed)),
        (w1s,     pl.BlockSpec((edge_types * msg_hid, n_in), fixed)),
        (w1r,     pl.BlockSpec((edge_types * msg_hid, n_in), fixed)),
        (b1,      pl.BlockSpec((edge_types * msg_hid, 1), fixed)),
        (w2bd,    pl.BlockSpec((edge_types * msg_out, edge_types * msg_hid), fixed)),
        (b2,      pl.BlockSpec((edge_types * msg_out, 1), fixed)),
        (sum_mat, pl.BlockSpec((msg_out, edge_types * msg_out), fixed)),
        (wo1x,    pl.BlockSpec((n_hid, n_in), fixed)),
        (wo1m,    pl.BlockSpec((n_hid, msg_out), fixed)),
        (bo1,     pl.BlockSpec((n_hid, 1), fixed)),
        (wo2,     pl.BlockSpec((n_hid, n_hid), fixed)),
        (bo2,     pl.BlockSpec((n_hid, 1), fixed)),
        (wo3,     pl.BlockSpec((n_out, n_hid), fixed)),
        (bo3,     pl.BlockSpec((n_out, 1), fixed)),
    ]
    args = [a for a, _ in operands]
    in_specs = [s for _, s in operands]

    # ---- explicit VMEM budget (mainly matters on v7x: 64 MiB physical) ------
    nbytes = lambda a: int(a.size) * a.dtype.itemsize
    invariant_bytes = sum(nbytes(a) for a in args[2:])
    varying_bytes = (nbytes(args[0]) + nbytes(args[1])) // steps + n_out * TB * N * 4
    act_bytes = 4 * TB * E * (edge_types * msg_hid + 2 * edge_types * msg_out + msg_out + 2 * n_in)
    act_bytes += 4 * TB * N * (2 * n_hid + n_out + msg_out)
    vmem_limit = int(min(64 * 1024 * 1024,
                         max(32 * 1024 * 1024,
                             2 * (invariant_bytes + varying_bytes) + act_bytes + (4 << 20))))

    out_steps = pl.pallas_call(
        _mlp_decoder_kernel,
        out_shape=jax.ShapeDtypeStruct((steps, n_out, TB * N), f32),
        grid_spec=pltpu.PrefetchScalarGridSpec(
            num_scalar_prefetch=0,
            grid=(steps,),
            in_specs=in_specs,
            out_specs=pl.BlockSpec((1, n_out, TB * N), step_map3),
        ),
        compiler_params=pltpu.CompilerParams(
            dimension_semantics=("parallel",),
            vmem_limit_bytes=vmem_limit),
    )(*args)

    # [steps, n_out, TB*N] -> [B, n_out, N]  (matches PyTorch output layout)
    out = jnp.transpose(out_steps.reshape(steps, n_out, TB, N), (0, 2, 1, 3))
    return out.reshape(Bp, n_out, N)[:B]


# ----------------------------------------------------------------------------
# Pure-JAX f32 reference (mirrors the PyTorch forward, eval mode).
# ----------------------------------------------------------------------------
def _reference(inputs, rel_rec, rel_send, rel_types, params, *, edge_types, msg_out):
    (mw1, mb1, mw2, mb2, ow1, ob1, ow2, ob2, ow3, ob3) = params
    x = jnp.transpose(inputs, (0, 2, 1))                       # [B, N, n_in]
    receivers = jnp.einsum('en,bnf->bef', rel_rec, x)
    senders = jnp.einsum('en,bnf->bef', rel_send, x)
    pre_msg = jnp.concatenate([senders, receivers], axis=2)    # [B, E, 2*n_in]
    all_msgs = jnp.zeros(pre_msg.shape[:2] + (msg_out,), jnp.float32)
    for i in range(edge_types):
        msg = jax.nn.relu(pre_msg @ mw1[i] + mb1[i])
        msg = jax.nn.relu(msg @ mw2[i] + mb2[i])
        msg = msg * rel_types[:, :, i:i + 1]
        all_msgs = all_msgs + msg
    agg = jnp.swapaxes(jnp.swapaxes(all_msgs, -2, -1) @ rel_rec, -2, -1)  # [B, N, msg_out]
    aug = jnp.concatenate([x, agg], axis=-1)
    p = jax.nn.relu(aug @ ow1 + ob1[0])
    p = jax.nn.relu(p @ ow2 + ob2[0])
    p = p @ ow3 + ob3[0]
    return jnp.transpose(p, (0, 2, 1))


if __name__ == "__main__":
    # Module hyperparameters (small, consistent with the forward semantics).
    n_in, n_hid, n_out = 4, 32, 4
    msg_hid, msg_out = 32, 16
    edge_types = 2
    B, N = 4, 8
    E = N * (N - 1)  # fully-connected graph without self-loops

    key = jax.random.PRNGKey(0)
    ks = jax.random.split(key, 16)

    def init(k, shape, fan_in):
        return (jax.random.normal(k, shape, jnp.float32) / np.sqrt(fan_in)).astype(jnp.float32)

    params = (
        init(ks[0], (edge_types, 2 * n_in, msg_hid), 2 * n_in),   # msg_fc1 weights
        init(ks[1], (edge_types, msg_hid), 2 * n_in),             # msg_fc1 biases
        init(ks[2], (edge_types, msg_hid, msg_out), msg_hid),     # msg_fc2 weights
        init(ks[3], (edge_types, msg_out), msg_hid),              # msg_fc2 biases
        init(ks[4], (n_in + msg_out, n_hid), n_in + msg_out),     # out_fc1
        init(ks[5], (1, n_hid), n_in + msg_out),
        init(ks[6], (n_hid, n_hid), n_hid),                       # out_fc2
        init(ks[7], (1, n_hid), n_hid),
        init(ks[8], (n_hid, n_out), n_hid),                       # out_fc3
        init(ks[9], (1, n_out), n_hid),
    )

    # One-hot relation matrices for all ordered node pairs (i != j).
    off_diag = np.ones((N, N), dtype=np.float32) - np.eye(N, dtype=np.float32)
    recv_idx, send_idx = np.where(off_diag)
    rel_rec = jnp.asarray(np.eye(N, dtype=np.float32)[recv_idx])    # [E, N]
    rel_send = jnp.asarray(np.eye(N, dtype=np.float32)[send_idx])   # [E, N]

    inputs = jax.random.normal(ks[10], (B, n_in, N), jnp.float32)   # [B, n_in, N]
    logits = jax.random.normal(ks[11], (B, E, edge_types), jnp.float32)
    rel_types = jax.nn.softmax(logits, axis=-1)                     # [B, E, ET]

    out = mlp_decoder_forward(inputs, rel_rec, rel_send, rel_types, params,
                              edge_types=edge_types, msg_out=msg_out, n_out=n_out)
    out = jax.block_until_ready(out)

    ref = _reference(inputs, rel_rec, rel_send, rel_types, params,
                     edge_types=edge_types, msg_out=msg_out)
    # Tolerance relaxed for bf16 matmul operands (accumulation stays f32).
    np.testing.assert_allclose(np.asarray(out), np.asarray(ref), rtol=5e-2, atol=5e-2)
    assert out.shape == (B, n_out, N)

    print("KERNEL_OK")
</pallas_src>

<mosaic_0001>
module attributes {stable_mosaic.version = 11 : i64} {
  func.func @_mlp_decoder_kernel(%arg0: i32, %arg1: memref<1x4x32xbf16, #tpu.memory_space<vmem>>, %arg2: memref<1x32x224xf32, #tpu.memory_space<vmem>>, %arg3: memref<32x224xbf16, #tpu.memory_space<vmem>>, %arg4: memref<32x224xbf16, #tpu.memory_space<vmem>>, %arg5: memref<224x32xbf16, #tpu.memory_space<vmem>>, %arg6: memref<64x4xbf16, #tpu.memory_space<vmem>>, %arg7: memref<64x4xbf16, #tpu.memory_space<vmem>>, %arg8: memref<64x1xf32, #tpu.memory_space<vmem>>, %arg9: memref<32x64xbf16, #tpu.memory_space<vmem>>, %arg10: memref<32x1xf32, #tpu.memory_space<vmem>>, %arg11: memref<16x32xbf16, #tpu.memory_space<vmem>>, %arg12: memref<32x4xbf16, #tpu.memory_space<vmem>>, %arg13: memref<32x16xbf16, #tpu.memory_space<vmem>>, %arg14: memref<32x1xf32, #tpu.memory_space<vmem>>, %arg15: memref<32x32xbf16, #tpu.memory_space<vmem>>, %arg16: memref<32x1xf32, #tpu.memory_space<vmem>>, %arg17: memref<4x32xbf16, #tpu.memory_space<vmem>>, %arg18: memref<4x1xf32, #tpu.memory_space<vmem>>, %arg19: memref<1x4x32xf32, #tpu.memory_space<vmem>>) attributes {dimension_semantics = [#tpu.dimension_semantics<parallel>], iteration_bounds = array<i64: 1>, scalar_prefetch = 0 : i64, scratch_operands = 0 : i64, tpu.core_type = #tpu.core_type<tc>, window_params = [{transform_indices = @transform_0, window_bounds = array<i64: 1, 4, 32>}, {transform_indices = @transform_1, window_bounds = array<i64: 1, 32, 224>}, {pipeline_mode = #tpu.pipeline_mode<synchronous>, transform_indices = @transform_2, window_bounds = array<i64: 32, 224>}, {pipeline_mode = #tpu.pipeline_mode<synchronous>, transform_indices = @transform_3, window_bounds = array<i64: 32, 224>}, {pipeline_mode = #tpu.pipeline_mode<synchronous>, transform_indices = @transform_4, window_bounds = array<i64: 224, 32>}, {pipeline_mode = #tpu.pipeline_mode<synchronous>, transform_indices = @transform_5, window_bounds = array<i64: 64, 4>}, {pipeline_mode = #tpu.pipeline_mode<synchronous>, transform_indices = @transform_6, window_bounds = array<i64: 64, 4>}, {pipeline_mode = #tpu.pipeline_mode<synchronous>, transform_indices = @transform_7, window_bounds = array<i64: 64, 1>}, {pipeline_mode = #tpu.pipeline_mode<synchronous>, transform_indices = @transform_8, window_bounds = array<i64: 32, 64>}, {pipeline_mode = #tpu.pipeline_mode<synchronous>, transform_indices = @transform_9, window_bounds = array<i64: 32, 1>}, {pipeline_mode = #tpu.pipeline_mode<synchronous>, transform_indices = @transform_10, window_bounds = array<i64: 16, 32>}, {pipeline_mode = #tpu.pipeline_mode<synchronous>, transform_indices = @transform_11, window_bounds = array<i64: 32, 4>}, {pipeline_mode = #tpu.pipeline_mode<synchronous>, transform_indices = @transform_12, window_bounds = array<i64: 32, 16>}, {pipeline_mode = #tpu.pipeline_mode<synchronous>, transform_indices = @transform_13, window_bounds = array<i64: 32, 1>}, {pipeline_mode = #tpu.pipeline_mode<synchronous>, transform_indices = @transform_14, window_bounds = array<i64: 32, 32>}, {pipeline_mode = #tpu.pipeline_mode<synchronous>, transform_indices = @transform_15, window_bounds = array<i64: 32, 1>}, {pipeline_mode = #tpu.pipeline_mode<synchronous>, transform_indices = @transform_16, window_bounds = array<i64: 4, 32>}, {pipeline_mode = #tpu.pipeline_mode<synchronous>, transform_indices = @transform_17, window_bounds = array<i64: 4, 1>}, {transform_indices = @transform_18, window_bounds = array<i64: 1, 4, 32>}]} {
    %c0 = arith.constant 0 : index
    %c0_0 = arith.constant 0 : index
    %c0_1 = arith.constant 0 : index
    %0 = vector.load %arg1[%c0, %c0_0, %c0_1] : memref<1x4x32xbf16, #tpu.memory_space<vmem>>, vector<1x4x32xbf16>
    %1 = vector.shape_cast %0 : vector<1x4x32xbf16> to vector<4x32xbf16>
    %c0_2 = arith.constant 0 : index
    %c0_3 = arith.constant 0 : index
    %2 = vector.load %arg3[%c0_2, %c0_3] : memref<32x224xbf16, #tpu.memory_space<vmem>>, vector<32x224xbf16>
    %cst = arith.constant dense<0.000000e+00> : vector<4x224xf32>
    %3 = tpu.matmul %1, %2, %cst {dimension_numbers = #tpu.dot_dimension_numbers<[1], [0], [0], [1], [0, 0, 1, 1], [], []>} : vector<4x32xbf16>, vector<32x224xbf16>, vector<4x224xf32> -> vector<4x224xf32>
    %4 = arith.truncf %3 : vector<4x224xf32> to vector<4x224xbf16>
    %c0_4 = arith.constant 0 : index
    %c0_5 = arith.constant 0 : index
    %5 = vector.load %arg4[%c0_4, %c0_5] : memref<32x224xbf16, #tpu.memory_space<vmem>>, vector<32x224xbf16>
    %cst_6 = arith.constant dense<0.000000e+00> : vector<4x224xf32>
    %6 = tpu.matmul %1, %5, %cst_6 {dimension_numbers = #tpu.dot_dimension_numbers<[1], [0], [0], [1], [0, 0, 1, 1], [], []>} : vector<4x32xbf16>, vector<32x224xbf16>, vector<4x224xf32> -> vector<4x224xf32>
    %7 = arith.truncf %6 : vector<4x224xf32> to vector<4x224xbf16>
    %c0_7 = arith.constant 0 : index
    %c0_8 = arith.constant 0 : index
    %8 = vector.load %arg6[%c0_7, %c0_8] : memref<64x4xbf16, #tpu.memory_space<vmem>>, vector<64x4xbf16>
    %cst_9 = arith.constant dense<0.000000e+00> : vector<64x224xf32>
    %9 = tpu.matmul %8, %4, %cst_9 {dimension_numbers = #tpu.dot_dimension_numbers<[1], [0], [0], [1], [0, 0, 1, 1], [], []>} : vector<64x4xbf16>, vector<4x224xbf16>, vector<64x224xf32> -> vector<64x224xf32>
    %c0_10 = arith.constant 0 : index
    %c0_11 = arith.constant 0 : index
    %10 = vector.load %arg7[%c0_10, %c0_11] : memref<64x4xbf16, #tpu.memory_space<vmem>>, vector<64x4xbf16>
    %cst_12 = arith.constant dense<0.000000e+00> : vector<64x224xf32>
    %11 = tpu.matmul %10, %7, %cst_12 {dimension_numbers = #tpu.dot_dimension_numbers<[1], [0], [0], [1], [0, 0, 1, 1], [], []>} : vector<64x4xbf16>, vector<4x224xbf16>, vector<64x224xf32> -> vector<64x224xf32>
    %12 = arith.addf %9, %11 : vector<64x224xf32>
    %c0_13 = arith.constant 0 : index
    %c0_14 = arith.constant 0 : index
    %13 = vector.load %arg8[%c0_13, %c0_14] : memref<64x1xf32, #tpu.memory_space<vmem>>, vector<64x1xf32>
    %14 = vector.broadcast %13 : vector<64x1xf32> to vector<64x224xf32>
    %15 = arith.addf %12, %14 : vector<64x224xf32>
    %cst_15 = arith.constant 0.000000e+00 : f32
    %16 = vector.broadcast %cst_15 : f32 to vector<64x224xf32>
    %17 = arith.maximumf %15, %16 : vector<64x224xf32>
    %c0_16 = arith.constant 0 : index
    %c0_17 = arith.constant 0 : index
    %18 = vector.load %arg9[%c0_16, %c0_17] : memref<32x64xbf16, #tpu.memory_space<vmem>>, vector<32x64xbf16>
    %19 = arith.truncf %17 : vector<64x224xf32> to vector<64x224xbf16>
    %cst_18 = arith.constant dense<0.000000e+00> : vector<32x224xf32>
    %20 = tpu.matmul %18, %19, %cst_18 {dimension_numbers = #tpu.dot_dimension_numbers<[1], [0], [0], [1], [0, 0, 1, 1], [], []>} : vector<32x64xbf16>, vector<64x224xbf16>, vector<32x224xf32> -> vector<32x224xf32>
    %c0_19 = arith.constant 0 : index
    %c0_20 = arith.constant 0 : index
    %21 = vector.load %arg10[%c0_19, %c0_20] : memref<32x1xf32, #tpu.memory_space<vmem>>, vector<32x1xf32>
    %22 = vector.broadcast %21 : vector<32x1xf32> to vector<32x224xf32>
    %23 = arith.addf %20, %22 : vector<32x224xf32>
    %cst_21 = arith.constant 0.000000e+00 : f32
    %24 = vector.broadcast %cst_21 : f32 to vector<32x224xf32>
    %25 = arith.maximumf %23, %24 : vector<32x224xf32>
    %c0_22 = arith.constant 0 : index
    %c0_23 = arith.constant 0 : index
    %c0_24 = arith.constant 0 : index
    %26 = vector.load %arg2[%c0_22, %c0_23, %c0_24] : memref<1x32x224xf32, #tpu.memory_space<vmem>>, vector<1x32x224xf32>
    %27 = vector.shape_cast %26 : vector<1x32x224xf32> to vector<32x224xf32>
    %28 = arith.mulf %25, %27 : vector<32x224xf32>
    %29 = arith.truncf %28 : vector<32x224xf32> to vector<32x224xbf16>
    %c0_25 = arith.constant 0 : index
    %c0_26 = arith.constant 0 : index
    %30 = vector.load %arg11[%c0_25, %c0_26] : memref<16x32xbf16, #tpu.memory_space<vmem>>, vector<16x32xbf16>
    %cst_27 = arith.constant dense<0.000000e+00> : vector<16x224xf32>
    %31 = tpu.matmul %30, %29, %cst_27 {dimension_numbers = #tpu.dot_dimension_numbers<[1], [0], [0], [1], [0, 0, 1, 1], [], []>} : vector<16x32xbf16>, vector<32x224xbf16>, vector<16x224xf32> -> vector<16x224xf32>
    %32 = arith.truncf %31 : vector<16x224xf32> to vector<16x224xbf16>
    %c0_28 = arith.constant 0 : index
    %c0_29 = arith.constant 0 : index
    %33 = vector.load %arg5[%c0_28, %c0_29] : memref<224x32xbf16, #tpu.memory_space<vmem>>, vector<224x32xbf16>
    %cst_30 = arith.constant dense<0.000000e+00> : vector<16x32xf32>
    %34 = tpu.matmul %32, %33, %cst_30 {dimension_numbers = #tpu.dot_dimension_numbers<[1], [0], [0], [1], [0, 0, 1, 1], [], []>} : vector<16x224xbf16>, vector<224x32xbf16>, vector<16x32xf32> -> vector<16x32xf32>
    %c0_31 = arith.constant 0 : index
    %c0_32 = arith.constant 0 : index
    %35 = vector.load %arg12[%c0_31, %c0_32] : memref<32x4xbf16, #tpu.memory_space<vmem>>, vector<32x4xbf16>
    %cst_33 = arith.constant dense<0.000000e+00> : vector<32x32xf32>
    %36 = tpu.matmul %35, %1, %cst_33 {dimension_numbers = #tpu.dot_dimension_numbers<[1], [0], [0], [1], [0, 0, 1, 1], [], []>} : vector<32x4xbf16>, vector<4x32xbf16>, vector<32x32xf32> -> vector<32x32xf32>
    %c0_34 = arith.constant 0 : index
    %c0_35 = arith.constant 0 : index
    %37 = vector.load %arg13[%c0_34, %c0_35] : memref<32x16xbf16, #tpu.memory_space<vmem>>, vector<32x16xbf16>
    %38 = arith.truncf %34 : vector<16x32xf32> to vector<16x32xbf16>
    %cst_36 = arith.constant dense<0.000000e+00> : vector<32x32xf32>
    %39 = tpu.matmul %37, %38, %cst_36 {dimension_numbers = #tpu.dot_dimension_numbers<[1], [0], [0], [1], [0, 0, 1, 1], [], []>} : vector<32x16xbf16>, vector<16x32xbf16>, vector<32x32xf32> -> vector<32x32xf32>
    %40 = arith.addf %36, %39 : vector<32x32xf32>
    %c0_37 = arith.constant 0 : index
    %c0_38 = arith.constant 0 : index
    %41 = vector.load %arg14[%c0_37, %c0_38] : memref<32x1xf32, #tpu.memory_space<vmem>>, vector<32x1xf32>
    %42 = vector.broadcast %41 : vector<32x1xf32> to vector<32x32xf32>
    %43 = arith.addf %40, %42 : vector<32x32xf32>
    %cst_39 = arith.constant 0.000000e+00 : f32
    %44 = vector.broadcast %cst_39 : f32 to vector<32x32xf32>
    %45 = arith.maximumf %43, %44 : vector<32x32xf32>
    %c0_40 = arith.constant 0 : index
    %c0_41 = arith.constant 0 : index
    %46 = vector.load %arg15[%c0_40, %c0_41] : memref<32x32xbf16, #tpu.memory_space<vmem>>, vector<32x32xbf16>
    %47 = arith.truncf %45 : vector<32x32xf32> to vector<32x32xbf16>
    %cst_42 = arith.constant dense<0.000000e+00> : vector<32x32xf32>
    %48 = tpu.matmul %46, %47, %cst_42 {dimension_numbers = #tpu.dot_dimension_numbers<[1], [0], [0], [1], [0, 0, 1, 1], [], []>} : vector<32x32xbf16>, vector<32x32xbf16>, vector<32x32xf32> -> vector<32x32xf32>
    %c0_43 = arith.constant 0 : index
    %c0_44 = arith.constant 0 : index
    %49 = vector.load %arg16[%c0_43, %c0_44] : memref<32x1xf32, #tpu.memory_space<vmem>>, vector<32x1xf32>
    %50 = vector.broadcast %49 : vector<32x1xf32> to vector<32x32xf32>
    %51 = arith.addf %48, %50 : vector<32x32xf32>
    %cst_45 = arith.constant 0.000000e+00 : f32
    %52 = vector.broadcast %cst_45 : f32 to vector<32x32xf32>
    %53 = arith.maximumf %51, %52 : vector<32x32xf32>
    %c0_46 = arith.constant 0 : index
    %c0_47 = arith.constant 0 : index
    %54 = vector.load %arg17[%c0_46, %c0_47] : memref<4x32xbf16, #tpu.memory_space<vmem>>, vector<4x32xbf16>
    %55 = arith.truncf %53 : vector<32x32xf32> to vector<32x32xbf16>
    %cst_48 = arith.constant dense<0.000000e+00> : vector<4x32xf32>
    %56 = tpu.matmul %54, %55, %cst_48 {dimension_numbers = #tpu.dot_dimension_numbers<[1], [0], [0], [1], [0, 0, 1, 1], [], []>} : vector<4x32xbf16>, vector<32x32xbf16>, vector<4x32xf32> -> vector<4x32xf32>
    %c0_49 = arith.constant 0 : index
    %c0_50 = arith.constant 0 : index
    %57 = vector.load %arg18[%c0_49, %c0_50] : memref<4x1xf32, #tpu.memory_space<vmem>>, vector<4x1xf32>
    %58 = vector.broadcast %57 : vector<4x1xf32> to vector<4x32xf32>
    %59 = arith.addf %56, %58 : vector<4x32xf32>
    %c0_51 = arith.constant 0 : index
    %c0_52 = arith.constant 0 : index
    %c0_53 = arith.constant 0 : index
    %60 = vector.load %arg19[%c0_51, %c0_52, %c0_53] : memref<1x4x32xf32, #tpu.memory_space<vmem>>, vector<1x4x32xf32>
    %61 = vector.shape_cast %60 : vector<1x4x32xf32> to vector<4x32xf32>
    %62 = vector.shape_cast %59 : vector<4x32xf32> to vector<1x4x32xf32>
    tpu.vector_store %arg19[%c0_51, %c0_52, %c0_53], %62 {strides = array<i32>} : memref<1x4x32xf32, #tpu.memory_space<vmem>>, vector<1x4x32xf32>,
    return
  }
  func.func @transform_0(%arg0: i32) -> (i32, i32, i32) {
    %c0_i32 = arith.constant 0 : i32
    %c0_i32_0 = arith.constant 0 : i32
    %c0_i32_1 = arith.constant 0 : i32
    return %arg0, %c0_i32, %c0_i32_0 : i32, i32, i32
  }
  func.func @transform_1(%arg0: i32) -> (i32, i32, i32) {
    %c0_i32 = arith.constant 0 : i32
    %c0_i32_0 = arith.constant 0 : i32
    %c0_i32_1 = arith.constant 0 : i32
    return %arg0, %c0_i32, %c0_i32_0 : i32, i32, i32
  }
  func.func @transform_2(%arg0: i32) -> (i32, i32) {
    %c0_i32 = arith.constant 0 : i32
    %c0_i32_0 = arith.constant 0 : i32
    %c0_i32_1 = arith.constant 0 : i32
    return %c0_i32, %c0_i32_0 : i32, i32
  }
  func.func @transform_3(%arg0: i32) -> (i32, i32) {
    %c0_i32 = arith.constant 0 : i32
    %c0_i32_0 = arith.constant 0 : i32
    %c0_i32_1 = arith.constant 0 : i32
    return %c0_i32, %c0_i32_0 : i32, i32
  }
  func.func @transform_4(%arg0: i32) -> (i32, i32) {
    %c0_i32 = arith.constant 0 : i32
    %c0_i32_0 = arith.constant 0 : i32
    %c0_i32_1 = arith.constant 0 : i32
    return %c0_i32, %c0_i32_0 : i32, i32
  }
  func.func @transform_5(%arg0: i32) -> (i32, i32) {
    %c0_i32 = arith.constant 0 : i32
    %c0_i32_0 = arith.constant 0 : i32
    %c0_i32_1 = arith.constant 0 : i32
    return %c0_i32, %c0_i32_0 : i32, i32
  }
  func.func @transform_6(%arg0: i32) -> (i32, i32) {
    %c0_i32 = arith.constant 0 : i32
    %c0_i32_0 = arith.constant 0 : i32
    %c0_i32_1 = arith.constant 0 : i32
    return %c0_i32, %c0_i32_0 : i32, i32
  }
  func.func @transform_7(%arg0: i32) -> (i32, i32) {
    %c0_i32 = arith.constant 0 : i32
    %c0_i32_0 = arith.constant 0 : i32
    %c0_i32_1 = arith.constant 0 : i32
    return %c0_i32, %c0_i32_0 : i32, i32
  }
  func.func @transform_8(%arg0: i32) -> (i32, i32) {
    %c0_i32 = arith.constant 0 : i32
    %c0_i32_0 = arith.constant 0 : i32
    %c0_i32_1 = arith.constant 0 : i32
    return %c0_i32, %c0_i32_0 : i32, i32
  }
  func.func @transform_9(%arg0: i32) -> (i32, i32) {
    %c0_i32 = arith.constant 0 : i32
    %c0_i32_0 = arith.constant 0 : i32
    %c0_i32_1 = arith.constant 0 : i32
    return %c0_i32, %c0_i32_0 : i32, i32
  }
  func.func @transform_10(%arg0: i32) -> (i32, i32) {
    %c0_i32 = arith.constant 0 : i32
    %c0_i32_0 = arith.constant 0 : i32
    %c0_i32_1 = arith.constant 0 : i32
    return %c0_i32, %c0_i32_0 : i32, i32
  }
  func.func @transform_11(%arg0: i32) -> (i32, i32) {
    %c0_i32 = arith.constant 0 : i32
    %c0_i32_0 = arith.constant 0 : i32
    %c0_i32_1 = arith.constant 0 : i32
    return %c0_i32, %c0_i32_0 : i32, i32
  }
  func.func @transform_12(%arg0: i32) -> (i32, i32) {
    %c0_i32 = arith.constant 0 : i32
    %c0_i32_0 = arith.constant 0 : i32
    %c0_i32_1 = arith.constant 0 : i32
    return %c0_i32, %c0_i32_0 : i32, i32
  }
  func.func @transform_13(%arg0: i32) -> (i32, i32) {
    %c0_i32 = arith.constant 0 : i32
    %c0_i32_0 = arith.constant 0 : i32
    %c0_i32_1 = arith.constant 0 : i32
    return %c0_i32, %c0_i32_0 : i32, i32
  }
  func.func @transform_14(%arg0: i32) -> (i32, i32) {
    %c0_i32 = arith.constant 0 : i32
    %c0_i32_0 = arith.constant 0 : i32
    %c0_i32_1 = arith.constant 0 : i32
    return %c0_i32, %c0_i32_0 : i32, i32
  }
  func.func @transform_15(%arg0: i32) -> (i32, i32) {
    %c0_i32 = arith.constant 0 : i32
    %c0_i32_0 = arith.constant 0 : i32
    %c0_i32_1 = arith.constant 0 : i32
    return %c0_i32, %c0_i32_0 : i32, i32
  }
  func.func @transform_16(%arg0: i32) -> (i32, i32) {
    %c0_i32 = arith.constant 0 : i32
    %c0_i32_0 = arith.constant 0 : i32
    %c0_i32_1 = arith.constant 0 : i32
    return %c0_i32, %c0_i32_0 : i32, i32
  }
  func.func @transform_17(%arg0: i32) -> (i32, i32) {
    %c0_i32 = arith.constant 0 : i32
    %c0_i32_0 = arith.constant 0 : i32
    %c0_i32_1 = arith.constant 0 : i32
    return %c0_i32, %c0_i32_0 : i32, i32
  }
  func.func @transform_18(%arg0: i32) -> (i32, i32, i32) {
    %c0_i32 = arith.constant 0 : i32
    %c0_i32_0 = arith.constant 0 : i32
    %c0_i32_1 = arith.constant 0 : i32
    return %arg0, %c0_i32, %c0_i32_0 : i32, i32, i32
  }
}

</mosaic_0001>

<bundles_post_ra>
// kernel: tpu_custom_call.1
= control target key start
LH: loop header
LB: loop body
LE: loop exit
PB: predicated region body
PF: predicated region fallthrough
CT: control target
= control target key end

     0   :  { %s1782_s0 = inlined_call_operand.vmem [shape: bf16[1,4,32], index: 0, kind: input, shape index: {}]   ;;  %s1783_s1 = inlined_call_operand.vmem [shape: f32[1,32,224], index: 1, kind: input, shape index: {}]   ;;  %s1784_s2 = inlined_call_operand.vmem [shape: bf16[32,224], index: 2, kind: input, shape index: {}]   ;;  %s1785_s3 = inlined_call_operand.vmem [shape: bf16[32,224], index: 3, kind: input, shape index: {}]   ;;  %s1786_s4 = inlined_call_operand.vmem [shape: bf16[224,32], index: 4, kind: input, shape index: {}]   ;;  %s1787_s5 = inlined_call_operand.vmem [shape: bf16[64,4], index: 5, kind: input, shape index: {}]   ;;  %s1788_s6 = inlined_call_operand.vmem [shape: bf16[64,4], index: 6, kind: input, shape index: {}]   ;;  %s1789_s7 = inlined_call_operand.vmem [shape: f32[64,1], index: 7, kind: input, shape index: {}]   ;;  %s1790_s8 = inlined_call_operand.vmem [shape: bf16[32,64], index: 8, kind: input, shape index: {}]   ;;  %s1791_s9 = inlined_call_operand.vmem [shape: f32[32,1], index: 9, kind: input, shape index: {}]   ;;  %s1792_s10 = inlined_call_operand.vmem [shape: bf16[16,32], index: 10, kind: input, shape index: {}]   ;;  %s1793_s11 = inlined_call_operand.vmem [shape: bf16[32,4], index: 11, kind: input, shape index: {}]   ;;  %s1794_s12 = inlined_call_operand.vmem [shape: bf16[32,16], index: 12, kind: input, shape index: {}]   ;;  %s1795_s13 = inlined_call_operand.vmem [shape: f32[32,1], index: 13, kind: input, shape index: {}]   ;;  %s1796_s14 = inlined_call_operand.vmem [shape: bf16[32,32], index: 14, kind: input, shape index: {}]   ;;  %s1797_s15 = inlined_call_operand.vmem [shape: f32[32,1], index: 15, kind: input, shape index: {}]   ;;  %s1798_s16 = inlined_call_operand.vmem [shape: bf16[4,32], index: 16, kind: input, shape index: {}]   ;;  %s1799_s17 = inlined_call_operand.vmem [shape: f32[4,1], index: 17, kind: input, shape index: {}]   ;;  %s1800_s18 = inlined_call_operand.hbm [shape: f32[1,4,32], index: 18, kind: output, shape index: {}]  }
   0x1   :  { %1803 = sst [smem:[#allocation5_spill]] %s1782_s0 }
   0x2   :  { %1804 = sst [smem:[#allocation6_spill]] %s1783_s1 }
   0x3   :  { %1805 = sst [smem:[#allocation7_spill]] %s1784_s2 }
   0x4   :  { %v1337_v0 = vld [vmem:[%s1785_s3 + $0x4] ss:$8 sps:$4 sm:$0xff]   ;;  %v1339_v1 = vld [vmem:[%s1785_s3] ss:$8 sps:$4 sm:$0xff]   ;;  %v1404_v2 = vmov 0   ;;  %s1806_s2 = sld [smem:[#allocation7_spill]] }
   0x5   :  { %189 = vmatprep.mubr.bf16.mxu1 %v1404_v2  ;;  %122 = vmatprep.mubr.bf16.mxu0 %v1404_v2  ;;  %v1340_v3 = vld [vmem:[%s1785_s3 + $0x14] ss:$8 sps:$4 sm:$0xff]   ;;  %v1342_v4 = vld [vmem:[%s1785_s3 + $0x10] ss:$8 sps:$4 sm:$0xff]   ;;  %vm86_vm0 = vcmask 261120   ;;  %s1807_s27 = sld [smem:[#allocation5_spill]] }
   0x6   :  { %157 = vmatprep.subr.bf16.mxu1 %v1337_v0  ;;  %1335 = vset.pattern.permute.xlu0 %v1404_v2 }
   0x7   :  { %158 = vmatpush1.bf16.msra.mxu1 %v1339_v1  ;;  %1336 = vset.pattern.permute.xlu1 %v1404_v2 }
   0x8   :  { %159 = vmatprep.subr.bf16.mxu1 %v1340_v3 }
   0xa   :  { %v1343_v5 = vld [vmem:[%s1806_s2 + $0x4] ss:$8 sps:$4 sm:$0xff]   ;;  %v1345_v6 = vld [vmem:[%s1806_s2] ss:$8 sps:$4 sm:$0xff]   ;;  %v1346_v8 = vld [vmem:[%s1806_s2 + $0x14] ss:$8 sps:$4 sm:$0xff]  }
   0xb   :  { %v1528_v7 = vld [vmem:[%s1807_s27] sm:$0x3]  ;;  %90 = vmatprep.subr.bf16.mxu0 %v1343_v5  ;;  %v1348_v9 = vld [vmem:[%s1806_s2 + $0x10] ss:$8 sps:$4 sm:$0xff]   ;;  %160 = vmatpush1.bf16.msra.mxu1 %v1342_v4 }
   0xc   :  { %91 = vmatpush1.bf16.msra.mxu0 %v1345_v6 }
   0xd   :  { %92 = vmatprep.subr.bf16.mxu0 %v1346_v8 }
   0xe   :  { %1216 = vmatmul.mubr.msk.bf16.vlgmr.msra.gmra.mrb[0].mxu1 %vm86_vm0, %v1528_v7 }
   0xf   :  { %605 = vmatprep.mubr.bf16.mxu1 %v1404_v2 }
  0x10   :  { %93 = vmatpush1.bf16.msra.mxu0 %v1348_v9 }
  0x13   :  { %1211 = vmatmul.mubr.msk.bf16.vlgmr.msra.gmra.mrb[0].mxu0 %vm86_vm0, %v1528_v7 }
  0x14   :  { %288 = vmatprep.mubr.bf16.mxu0 %v1404_v2 }
  0x15   :  { %23 = vsyncpa [#allocation3], 0  ;;  %v440_v10 = vld [vmem:[%s1789_s7] sm:$0xff]  ;;  %v442_v11 = vld [vmem:[%s1789_s7 + $0x10] sm:$0xff]  ;;  %vm249_vm1 = vcmask 1041408   ;;  %vm236_vm2 = vcmask 31744  }
  0x16   :  { %450 = vperm.xlu0 %1335, %v440_v10   ;;  %460 = vperm.xlu1 %1336, %v442_v11   ;;  %v441_v12 = vld [vmem:[%s1789_s7 + $0x8] sm:$0xff]  ;;  %v443_v13 = vld [vmem:[%s1789_s7 + $0x18] sm:$0xff]  ;;  %v444_v14 = vld [vmem:[%s1789_s7 + $0x20] sm:$0xff]  ;;  %vm566_vm3 = vcmask 523264   ;;  %s1808_s2 = sld [smem:[#allocation6_spill]]  ;;  %vm821_vm4 = vcmask 785408  }
  0x17   :  { %v445_v15 = vld [vmem:[%s1789_s7 + $0x28] sm:$0xff]  ;;  %v446_v16 = vld [vmem:[%s1789_s7 + $0x30] sm:$0xff]  ;;  %v447_v17 = vld [vmem:[%s1789_s7 + $0x38] sm:$0xff]  ;;  %vm885_vm5 = vcmask 130048   ;;  %vm1406_vm6 = vmmov 0   ;;  %s1407_s7 = smov [#allocation2]  }
  0x18   :  { %v532_v18 = vld [vmem:[%s1791_s9] sm:$0xff]  ;;  %v533_v19 = vld [vmem:[%s1791_s9 + $0x8] sm:$0xff]  ;;  %v534_v20 = vld [vmem:[%s1791_s9 + $0x10] sm:$0xff]  ;;  %s1199_s24 = sshll.u32 %s1407_s7, 4  ;;  %vm1191_vm7 = vcmask 257024   ;;  %s1200_s24 = int_to_ptr.vmem [resolvable:$true] %s1199_s24 }
  0x19   :  { %v535_v21 = vld [vmem:[%s1791_s9 + $0x18] sm:$0xff]  ;;  %v1008_v22 = vld [vmem:[%s1795_s13] sm:$0xff]  ;;  %v1009_v23 = vld [vmem:[%s1795_s13 + $0x8] sm:$0xff]  ;;  %s1380_s25 = scalar_lea.vmem %s1200_s24, 64  ;;  %p1385_p1 = scmp.lt.s32.totalorder %s1200_s24, %s1200_s24 }
  0x1a   :  { %455 = vperm.xlu0 %1335, %v441_v12   ;;  %465 = vperm.xlu1 %1336, %v443_v13   ;;  %v1010_v24 = vld [vmem:[%s1795_s13 + $0x10] sm:$0xff]  ;;  %v1011_v25 = vld [vmem:[%s1795_s13 + $0x18] sm:$0xff]  ;;  %v1046_v26 = vld [vmem:[%s1797_s15] sm:$0xff]  ;;  %p1381_p0 = scmp.ne.s32.totalorder %s1200_s24, %s1380_s25  ;;  %p1386_p2 = scmp.lt.s32.totalorder %s1380_s25, %s1380_s25 }
  0x1b   :  { %v1047_v27 = vld [vmem:[%s1797_s15 + $0x8] sm:$0xff]  ;;  %v1048_v28 = vld [vmem:[%s1797_s15 + $0x10] sm:$0xff]  ;;  %v1049_v29 = vld [vmem:[%s1797_s15 + $0x18] sm:$0xff] }
  0x1c   :  { %v1142_v30 = vld [vmem:[%s1799_s17] sm:$0xf]  ;;  %v1350_v46 = vld [vmem:[%s1788_s6 + $0x8] sm:$0xff]   ;;  %v1351_v47 = vld [vmem:[%s1788_s6 + $0x10] sm:$0xff]   ;;  %p1387_p3 = por %p1386_p2, %p1385_p1 }
  0x1d   :  { %v1349_v39 = vld [vmem:[%s1788_s6] sm:$0xff]   ;;  %v1352_v48 = vld [vmem:[%s1788_s6 + $0x18] sm:$0xff]   ;;  %v1354_v50 = vld [vmem:[%s1787_s5 + $0x8] sm:$0xff]  }
  0x1e   :  { %470 = vperm.xlu0 %1335, %v444_v14   ;;  %475 = vperm.xlu1 %1336, %v445_v15   ;;  %v1353_v49 = vld [vmem:[%s1787_s5] sm:$0xff]   ;;  %v1355_v51 = vld [vmem:[%s1787_s5 + $0x10] sm:$0xff]   ;;  %v1356_v52 = vld [vmem:[%s1787_s5 + $0x18] sm:$0xff]   ;;  %p1388_p4 = pnand %p1387_p3, %p1381_p0 }
  0x22   :  { %480 = vperm.xlu0 %1335, %v446_v16   ;;  %485 = vperm.xlu1 %1336, %v447_v17  }
  0x26   :  { %538 = vperm.xlu0 %1335, %v532_v18   ;;  %543 = vperm.xlu1 %1336, %v533_v19  }
  0x2a   :  { %548 = vperm.xlu0 %1335, %v534_v20   ;;  %553 = vperm.xlu1 %1336, %v535_v21  }
  0x2e   :  { %1014 = vperm.xlu0 %1335, %v1008_v22   ;;  %1019 = vperm.xlu1 %1336, %v1009_v23  }
  0x32   :  { %1024 = vperm.xlu0 %1335, %v1010_v24   ;;  %1029 = vperm.xlu1 %1336, %v1011_v25  }
  0x36   :  { %1052 = vperm.xlu0 %1335, %v1046_v26   ;;  %1057 = vperm.xlu1 %1336, %v1047_v27  }
  0x3a   :  { %1062 = vperm.xlu0 %1335, %v1048_v28   ;;  %1067 = vperm.xlu1 %1336, %v1049_v29  }
  0x3e   :  { %1145 = vperm.xlu0 %1335, %v1142_v30  }
  0x95   :  { %v451_v53 = vpop.permute.xlu0 %450  ;;  %v461_v62 = vpop.permute.xlu1 %460 }
  0x99   :  { %v456_v57 = vpop.permute.xlu0 %455  ;;  %v466_v11 = vpop.permute.xlu1 %465 }
  0x9d   :  { %v471_v22 = vpop.permute.xlu0 %470  ;;  %v476_v27 = vpop.permute.xlu1 %475 }
  0xe1   :  { %v191_v31 = vpop.f32.mrb[0].mxu1 }
  0xe2   :  { %v198_v32 = vpack.c.bf16 %v191_v31, %v191_v31  ;;  %v193_v33 = vpop.f32.mrb[1].mxu1 }
  0xe3   :  { %v199_v34 = vpack.c.bf16 %v193_v33, %v193_v33  ;;  %v195_v35 = vpop.f32.mrb[2].mxu1 }
  0xe4   :  { %v251_v36 = vsel %vm249_vm1, %v198_v32, 0  ;;  %v196_v37 = vpop.f32.mrb[3].mxu1 }
  0xe5   :  { %1221 = vmatprep.subr.msk.bf16.mxu0 %vm249_vm1, %v199_v34 }
  0xe6   :  { %v124_v38 = vpop.f32.mrb[0].mxu0  ;;  %257 = vmatpush1.bf16.msra.mxu0 %v251_v36 }
  0xe7   :  { %v131_v40 = vpack.c.bf16 %v124_v38, %v124_v38  ;;  %v126_v41 = vpop.f32.mrb[1].mxu0  ;;  %v481_v38 = vpop.permute.xlu0 %480 }
  0xe8   :  { %v132_v42 = vpack.c.bf16 %v126_v41, %v126_v41  ;;  %v128_v43 = vpop.f32.mrb[2].mxu0 }
  0xe9   :  { %v362_v44 = vsel %vm249_vm1, %v131_v40, 0  ;;  %v129_v45 = vpop.f32.mrb[3].mxu0  ;;  %1222 = vmatmul.mubr.msk.bf16.vlgmr.msra.gmra.mrb[4].mxu0 %vm236_vm2, %v1349_v39  ;;  %v486_v43 = vpop.permute.xlu1 %485 }
  0xea   :  { %1230 = vmatprep.subr.msk.bf16.mxu0 %vm249_vm1, %v132_v42  ;;  %298 = vmatprep.mubr.bf16.mxu0 %v1404_v2 }
  0xeb   :  { %368 = vmatpush1.bf16.msra.mxu0 %v362_v44 }
  0xf1   :  { %1223 = vmatmul.mubr.msk.bf16.gmra.mrb[8].mxu0 %vm236_vm2, %v1350_v46 }
  0xf2   :  { %308 = vmatprep.mubr.bf16.mxu0 %v1404_v2 }
  0xf9   :  { %1224 = vmatmul.mubr.msk.bf16.gmra.mrb[12].mxu0 %vm236_vm2, %v1351_v47 }
  0xfa   :  { %318 = vmatprep.mubr.bf16.mxu0 %v1404_v2 }
 0x101   :  { %1225 = vmatmul.mubr.msk.bf16.gmra.mrb[16].mxu0 %vm236_vm2, %v1352_v48 }
 0x102   :  { %399 = vmatprep.mubr.bf16.mxu0 %v1404_v2 }
 0x109   :  { %1231 = vmatmul.mubr.msk.bf16.vlgmr.msra.gmra.mrb[4].mxu0 %vm236_vm2, %v1353_v49 }
 0x10a   :  { %409 = vmatprep.mubr.bf16.mxu0 %v1404_v2 }
 0x111   :  { %1232 = vmatmul.mubr.msk.bf16.gmra.mrb[8].mxu0 %vm236_vm2, %v1354_v50 }
 0x112   :  { %419 = vmatprep.mubr.bf16.mxu0 %v1404_v2 }
 0x119   :  { %1233 = vmatmul.mubr.msk.bf16.gmra.mrb[12].mxu0 %vm236_vm2, %v1355_v51 }
 0x11a   :  { %429 = vmatprep.mubr.bf16.mxu0 %v1404_v2 }
 0x121   :  { %1234 = vmatmul.mubr.msk.bf16.gmra.mrb[16].mxu0 %vm236_vm2, %v1356_v52 }
 0x1dc   :  { %v401_v54 = vpop.f32.mrb[4].mxu0 }
 0x1dd   :  { %v488_v55 = vadd.f32 %v451_v53, %v401_v54  ;;  %v403_v56 = vpop.f32.mrb[5].mxu0 }
 0x1de   :  { %v489_v58 = vadd.f32 %v451_v53, %v403_v56  ;;  %v405_v59 = vpop.f32.mrb[6].mxu0  ;;  %v1358_v56 = vld [vmem:[%s1790_s8 + $0x8] sm:$0xff]  }
 0x1df   :  { %v490_v60 = vadd.f32 %v456_v57, %v405_v59  ;;  %v407_v61 = vpop.f32.mrb[7].mxu0  ;;  %v504_v0 = vmax.f32 %v488_v55, 0.0  ;;  %v1357_v55 = vld [vmem:[%s1790_s8] sm:$0xff]  }
 0x1e0   :  { %v491_v63 = vadd.f32 %v456_v57, %v407_v61  ;;  %v505_v3 = vmax.f32 %v489_v58, 0.0  ;;  %v539_v57 = vpop.permute.xlu0 %538  ;;  %v544_v61 = vpop.permute.xlu1 %543 }
 0x1e1   :  { %v506_v1 = vmax.f32 %v490_v60, 0.0 }
 0x1e2   :  { %v507_v4 = vmax.f32 %v491_v63, 0.0 }
 0x1e3   :  { %v524_v5 = vpack.c.bf16 %v506_v1, %v504_v0 }
 0x1e4   :  { %v525_v6 = vpack.c.bf16 %v507_v4, %v505_v3  ;;  %v411_v8 = vpop.f32.mrb[8].mxu0  ;;  %v634_v4 = vld [vmem:[%s1808_s2] sm:$0xff] }
 0x1e5   :  { %v492_v9 = vadd.f32 %v461_v62, %v411_v8  ;;  %v413_v10 = vpop.f32.mrb[9].mxu0 }
 0x1e6   :  { %v493_v12 = vadd.f32 %v461_v62, %v413_v10  ;;  %v415_v13 = vpop.f32.mrb[10].mxu0  ;;  %573 = vmatprep.subr.bf16.mxu1 %v525_v6  ;;  %v636_v6 = vld [vmem:[%s1808_s2 + $0x10] sm:$0xff] }
 0x1e7   :  { %v494_v14 = vadd.f32 %v466_v11, %v415_v13  ;;  %v417_v15 = vpop.f32.mrb[11].mxu0  ;;  %574 = vmatpush1.bf16.msra.mxu1 %v524_v5  ;;  %v508_v17 = vmax.f32 %v492_v9, 0.0  ;;  %v635_v9 = vld [vmem:[%s1808_s2 + $0x8] sm:$0xff] }
 0x1e8   :  { %v495_v16 = vadd.f32 %v466_v11, %v417_v15  ;;  %v509_v19 = vmax.f32 %v493_v12, 0.0  ;;  %v637_v11 = vld [vmem:[%s1808_s2 + $0x18] sm:$0xff]  ;;  %v549_v15 = vpop.permute.xlu0 %548 }
 0x1e9   :  { %v510_v18 = vmax.f32 %v494_v14, 0.0 }
 0x1ea   :  { %v511_v20 = vmax.f32 %v495_v16, 0.0 }
 0x1eb   :  { %v526_v21 = vpack.c.bf16 %v510_v18, %v508_v17 }
 0x1ec   :  { %v527_v23 = vpack.c.bf16 %v511_v20, %v509_v19  ;;  %v421_v24 = vpop.f32.mrb[12].mxu0 }
 0x1ed   :  { %v496_v25 = vadd.f32 %v471_v22, %v421_v24  ;;  %v423_v26 = vpop.f32.mrb[13].mxu0 }
 0x1ee   :  { %v497_v28 = vadd.f32 %v471_v22, %v423_v26  ;;  %v425_v29 = vpop.f32.mrb[14].mxu0  ;;  %575 = vmatprep.subr.bf16.mxu1 %v527_v23  ;;  %v554_v22 = vpop.permute.xlu1 %553 }
 0x1ef   :  { %v498_v30 = vadd.f32 %v476_v27, %v425_v29  ;;  %v427_v31 = vpop.f32.mrb[15].mxu0  ;;  %576 = vmatpush1.bf16.msra.mxu1 %v526_v21  ;;  %v512_v33 = vmax.f32 %v496_v25, 0.0  ;;  %v638_v29 = vld [vmem:[%s1808_s2 + $0x20] sm:$0xff] }
 0x1f0   :  { %v499_v32 = vadd.f32 %v476_v27, %v427_v31  ;;  %v513_v35 = vmax.f32 %v497_v28, 0.0  ;;  %v640_v31 = vld [vmem:[%s1808_s2 + $0x30] sm:$0xff] }
 0x1f1   :  { %v514_v34 = vmax.f32 %v498_v30, 0.0 }
 0x1f2   :  { %v515_v36 = vmax.f32 %v499_v32, 0.0 }
 0x1f3   :  { %v528_v37 = vpack.c.bf16 %v514_v34, %v512_v33  ;;  %v639_v33 = vld [vmem:[%s1808_s2 + $0x28] sm:$0xff] }
 0x1f4   :  { %v529_v39 = vpack.c.bf16 %v515_v36, %v513_v35  ;;  %v431_v40 = vpop.f32.mrb[16].mxu0  ;;  %v641_v35 = vld [vmem:[%s1808_s2 + $0x38] sm:$0xff] }
 0x1f5   :  { %v500_v41 = vadd.f32 %v481_v38, %v431_v40  ;;  %v433_v42 = vpop.f32.mrb[17].mxu0 }
 0x1f6   :  { %v501_v44 = vadd.f32 %v481_v38, %v433_v42  ;;  %v435_v45 = vpop.f32.mrb[18].mxu0  ;;  %577 = vmatprep.subr.bf16.mxu1 %v529_v39 }
 0x1f7   :  { %v502_v46 = vadd.f32 %v486_v43, %v435_v45  ;;  %v437_v47 = vpop.f32.mrb[19].mxu0  ;;  %578 = vmatpush1.bf16.msra.mxu1 %v528_v37  ;;  %v516_v49 = vmax.f32 %v500_v41, 0.0  ;;  %v1361_v45 = vld [vmem:[%s1786_s4 + $0x8] sm:$0xff]  }
 0x1f8   :  { %v503_v48 = vadd.f32 %v486_v43, %v437_v47  ;;  %v517_v51 = vmax.f32 %v501_v44, 0.0  ;;  %v1359_v43 = vld [vmem:[%s1792_s10] sm:$0xff]   ;;  %v1363_v47 = vld [vmem:[%s1786_s4 + $0x18] sm:$0xff]  }
 0x1f9   :  { %v518_v50 = vmax.f32 %v502_v46, 0.0  ;;  %v1360_v44 = vld [vmem:[%s1786_s4] sm:$0xff]   ;;  %v1362_v46 = vld [vmem:[%s1786_s4 + $0x10] sm:$0xff]  }
 0x1fa   :  { %v519_v52 = vmax.f32 %v503_v48, 0.0  ;;  %v1364_v48 = vld [vmem:[%s1786_s4 + $0x20] sm:$0xff]  }
 0x1fb   :  { %v530_v53 = vpack.c.bf16 %v518_v50, %v516_v49  ;;  %v1365_v49 = vld [vmem:[%s1786_s4 + $0x28] sm:$0xff]   ;;  %v1366_v50 = vld [vmem:[%s1786_s4 + $0x30] sm:$0xff]  }
 0x1fc   :  { %v531_v54 = vpack.c.bf16 %v519_v52, %v517_v51  ;;  %v1367_v51 = vld [vmem:[%s1786_s4 + $0x38] sm:$0xff]   ;;  %v1368_v52 = vld [vmem:[%s1786_s4 + $0x40] sm:$0xff]  }
 0x1fe   :  { %579 = vmatprep.subr.bf16.mxu1 %v531_v54  ;;  %v1370_v54 = vld [vmem:[%s1786_s4 + $0x50] sm:$0xff]  }
 0x1ff   :  { %580 = vmatpush1.bf16.msra.mxu1 %v530_v53  ;;  %v1369_v53 = vld [vmem:[%s1786_s4 + $0x48] sm:$0xff]  }
 0x202   :  { %1237 = vmatmul.mubr.msk.bf16.vlgmr.msra.gmra.mrb[4].mxu1 %vm566_vm3, %v1357_v55  ;;  %v1371_v55 = vld [vmem:[%s1786_s4 + $0x58] sm:$0xff]  }
 0x203   :  { %615 = vmatprep.mubr.bf16.mxu1 %v1404_v2 }
 0x20a   :  { %1238 = vmatmul.mubr.msk.bf16.gmra.mrb[8].mxu1 %vm566_vm3, %v1358_v56  ;;  %v1372_v56 = vld [vmem:[%s1786_s4 + $0x60] sm:$0xff]  }
 0x20b   :  { %696 = vmatprep.mubr.bf16.mxu1 %v1404_v2 }
 0x2d5   :  { %v607_v58 = vpop.f32.mrb[4].mxu1 }
 0x2d6   :  { %v608_v59 = vadd.f32 %v607_v58, %v539_v57  ;;  %v609_v60 = vpop.f32.mrb[5].mxu1 }
 0x2d7   :  { %v610_v62 = vadd.f32 %v609_v60, %v539_v57  ;;  %v611_v63 = vpop.f32.mrb[6].mxu1  ;;  %v1373_v57 = vld [vmem:[%s1786_s4 + $0x68] sm:$0xff]  }
 0x2d8   :  { %v626_v0 = vmax.f32 %v608_v59, 0.0  ;;  %v612_v1 = vadd.f32 %v611_v63, %v544_v61  ;;  %v613_v3 = vpop.f32.mrb[7].mxu1 }
 0x2d9   :  { %v627_v5 = vmax.f32 %v610_v62, 0.0  ;;  %v614_v8 = vadd.f32 %v613_v3, %v544_v61 }
 0x2da   :  { %v628_v10 = vmax.f32 %v612_v1, 0.0  ;;  %v642_v13 = vmul.f32 %v634_v4, %v626_v0  ;;  %v1374_v0 = vld [vmem:[%s1794_s12] sm:$0xff]  }
 0x2db   :  { %v629_v12 = vmax.f32 %v614_v8, 0.0  ;;  %v643_v16 = vmul.f32 %v635_v9, %v627_v5  ;;  %1284 = vmatprep.mubr.msk.bf16.mxu0 %vm885_vm5, %v1374_v0  ;;  %v1376_v8 = vld [vmem:[%s1793_s11] sm:$0xff]   ;;  %v957_v9 = vsel %vm249_vm1, %v1528_v7, 0 }
 0x2dc   :  { %v644_v14 = vmul.f32 %v636_v6, %v628_v10  ;;  %v1375_v6 = vld [vmem:[%s1794_s12 + $0x8] sm:$0xff]  }
 0x2dd   :  { %v645_v17 = vmul.f32 %v637_v11, %v629_v12  ;;  %v617_v18 = vpop.f32.mrb[8].mxu1  ;;  %v1377_v10 = vld [vmem:[%s1793_s11 + $0x8] sm:$0xff]   ;;  %v1378_v11 = vld [vmem:[%s1796_s14] sm:$0xff]   ;;  %v1015_v12 = vpop.permute.xlu0 %1014 }
 0x2de   :  { %v650_v19 = vpack.c.bf16 %v644_v14, %v642_v13  ;;  %v618_v20 = vadd.f32 %v617_v18, %v549_v15  ;;  %v619_v21 = vpop.f32.mrb[9].mxu1  ;;  %v1020_v13 = vpop.permute.xlu1 %1019 }
 0x2df   :  { %v620_v23 = vadd.f32 %v619_v21, %v549_v15  ;;  %v621_v24 = vpop.f32.mrb[10].mxu1  ;;  %v651_v25 = vpack.c.bf16 %v645_v17, %v643_v16 }
 0x2e0   :  { %v630_v26 = vmax.f32 %v618_v20, 0.0  ;;  %v622_v27 = vadd.f32 %v621_v24, %v554_v22  ;;  %v623_v28 = vpop.f32.mrb[11].mxu1 }
 0x2e1   :  { %v631_v30 = vmax.f32 %v620_v23, 0.0  ;;  %v624_v32 = vadd.f32 %v623_v28, %v554_v22  ;;  %664 = vmatprep.subr.bf16.mxu1 %v651_v25  ;;  %v1025_v14 = vpop.permute.xlu0 %1024 }
 0x2e2   :  { %v632_v34 = vmax.f32 %v622_v27, 0.0  ;;  %665 = vmatpush1.bf16.msra.mxu1 %v650_v19  ;;  %v646_v37 = vmul.f32 %v638_v29, %v630_v26  ;;  %v1030_v17 = vpop.permute.xlu1 %1029  ;;  %v1379_v29 = vld [vmem:[%s1796_s14 + $0x8] sm:$0xff]  }
 0x2e3   :  { %v633_v36 = vmax.f32 %v624_v32, 0.0  ;;  %v647_v39 = vmul.f32 %v639_v33, %v631_v30  ;;  %v1405_v30 = vmov 0.0  }
 0x2e4   :  { %v648_v38 = vmul.f32 %v640_v31, %v632_v34 }
 0x2e5   :  { %v649_v40 = vmul.f32 %v641_v35, %v633_v36  ;;  %v1053_v31 = vpop.permute.xlu0 %1052 }
 0x2e6   :  { %v652_v41 = vpack.c.bf16 %v648_v38, %v646_v37  ;;  %v1058_v32 = vpop.permute.xlu1 %1057 }
 0x2e7   :  { %v653_v42 = vpack.c.bf16 %v649_v40, %v647_v39 }
 0x2e9   :  { %666 = vmatprep.subr.bf16.mxu1 %v653_v42  ;;  %v1063_v33 = vpop.permute.xlu0 %1062 }
 0x2ea   :  { %667 = vmatpush1.bf16.msra.mxu1 %v652_v41  ;;  %v1068_v37 = vpop.permute.xlu1 %1067 }
 0x2eb   :  { %825 = vmatprep.subr.bf16.mxu1 %v1404_v2 }
 0x2ed   :  { %1240 = vmatmul.mubr.msk.bf16.vlgmr.msra.gmra.mrb[12].mxu1 %vm86_vm0, %v1359_v43 }
 0x2ee   :  { %826 = vmatpush1.bf16.msra.mxu1 %v1360_v44 }
 0x2ef   :  { %827 = vmatprep.subr.bf16.mxu1 %v1404_v2 }
 0x2f2   :  { %828 = vmatpush1.bf16.msra.mxu1 %v1361_v45 }
 0x2f3   :  { %829 = vmatprep.subr.bf16.mxu1 %v1404_v2 }
 0x2f6   :  { %830 = vmatpush1.bf16.msra.mxu1 %v1362_v46 }
 0x2f7   :  { %831 = vmatprep.subr.bf16.mxu1 %v1404_v2 }
 0x2fa   :  { %832 = vmatpush1.bf16.msra.mxu1 %v1363_v47 }
 0x2fb   :  { %833 = vmatprep.subr.bf16.mxu1 %v1404_v2 }
 0x2fe   :  { %834 = vmatpush1.bf16.msra.mxu1 %v1364_v48 }
 0x2ff   :  { %835 = vmatprep.subr.bf16.mxu1 %v1404_v2 }
 0x302   :  { %836 = vmatpush1.bf16.msra.mxu1 %v1365_v49  ;;  %v1139_v49 = vld [vmem:[%s1798_s16] sm:$0x3] }
 0x303   :  { %837 = vmatprep.subr.bf16.mxu1 %v1404_v2 }
 0x306   :  { %838 = vmatpush1.bf16.msra.mxu1 %v1366_v50  ;;  %v1146_v50 = vpop.permute.xlu0 %1145 }
 0x307   :  { %839 = vmatprep.subr.bf16.mxu1 %v1404_v2 }
 0x30a   :  { %840 = vmatpush1.bf16.msra.mxu1 %v1367_v51 }
 0x30b   :  { %841 = vmatprep.subr.bf16.mxu1 %v1404_v2 }
 0x30e   :  { %842 = vmatpush1.bf16.msra.mxu1 %v1368_v52 }
 0x30f   :  { %843 = vmatprep.subr.bf16.mxu1 %v1404_v2 }
 0x312   :  { %844 = vmatpush1.bf16.msra.mxu1 %v1369_v53 }
 0x313   :  { %845 = vmatprep.subr.bf16.mxu1 %v1404_v2 }
 0x316   :  { %846 = vmatpush1.bf16.msra.mxu1 %v1370_v54 }
 0x317   :  { %847 = vmatprep.subr.bf16.mxu1 %v1404_v2 }
 0x31a   :  { %848 = vmatpush1.bf16.msra.mxu1 %v1371_v55 }
 0x31b   :  { %849 = vmatprep.subr.bf16.mxu1 %v1404_v2 }
 0x31e   :  { %850 = vmatpush1.bf16.msra.mxu1 %v1372_v56 }
 0x31f   :  { %851 = vmatprep.subr.bf16.mxu1 %v1404_v2 }
 0x322   :  { %852 = vmatpush1.bf16.msra.mxu1 %v1373_v57 }
 0x3c0   :  { %v698_v58 = vpop.f32.mrb[12].mxu1 }
 0x3c1   :  { %v700_v59 = vpop.f32.mrb[13].mxu1 }
 0x3c2   :  { %v702_v60 = vpop.f32.mrb[14].mxu1 }
 0x3c3   :  { %v707_v61 = vpack.c.bf16 %v702_v60, %v698_v58  ;;  %v704_v62 = vpop.f32.mrb[15].mxu1 }
 0x3c4   :  { %v708_v63 = vpack.c.bf16 %v704_v62, %v700_v59 }
 0x3c6   :  { %1255 = vmatprep.mubr.msk.bf16.mxu1 %vm821_vm4, %v708_v63 }
 0x3c7   :  { %858 = vmatmul.mubr.bf16.vlgmr.msra.gmra.mrb[16].mxu1 %v707_v61 }
 0x49a   :  { %v859_v2 = vpop.f32.mrb[16].mxu1 }
 0x49b   :  { %v861_v1 = vpop.f32.mrb[17].mxu1 }
 0x49c   :  { %v862_v3 = vpop.f32.mrb[18].mxu1 }
 0x49d   :  { %v874_v4 = vpack.c.bf16 %v862_v3, %v859_v2  ;;  %v864_v5 = vpop.f32.mrb[19].mxu1 }
 0x49f   :  { %1282 = vmatprep.subr.bf16.mxu0 %v874_v4 }
 0x4a0   :  { %1283 = vmatpush3.bf16.msra.mxu0 %v874_v4 }
 0x4a1   :  { %1330 = vmatprep.subr.msk.bf16.mxu0 %vm249_vm1, %v1528_v7 }
 0x4a3   :  { %1285 = vmatmul.mubr.msk.bf16.vlgmr.msra.gmra.mrb[20].mxu0 %vm885_vm5, %v1375_v6 }
 0x4a4   :  { %1289 = vmatpush3.bf16.msra.mxu0 %v957_v9  ;;  %1290 = vmatprep.mubr.msk.bf16.mxu0 %vm236_vm2, %v1376_v8 }
 0x4af   :  { %1291 = vmatmul.mubr.msk.bf16.vlgmr.msra.gmra.mrb[20].mxu0 %vm236_vm2, %v1377_v10 }
 0x4b0   :  { %1298 = vmatprep.mubr.msk.bf16.mxu0 %vm86_vm0, %v1378_v11 }
 0x582   :  { %v1292_v7 = vpop.f32.mrb[20].mxu0 }
 0x583   :  { %v1034_v15 = vadd.f32 %v1292_v7, %v1025_v14  ;;  %v993_v16 = vpop.f32.mrb[21].mxu0 }
 0x584   :  { %v1032_v18 = vadd.f32 %v1015_v12, %v993_v16  ;;  %v1293_v19 = vpop.f32.mrb[22].mxu0 }
 0x585   :  { %v1035_v20 = vadd.f32 %v1293_v19, %v1030_v17  ;;  %v996_v21 = vpop.f32.mrb[23].mxu0  ;;  %v1038_v23 = vmax.f32 %v1034_v15, 0.0 }
 0x586   :  { %v1033_v22 = vadd.f32 %v1020_v13, %v996_v21  ;;  %v1036_v25 = vmax.f32 %v1032_v18, 0.0 }
 0x587   :  { %v1039_v24 = vmax.f32 %v1035_v20, 0.0 }
 0x588   :  { %v1037_v26 = vmax.f32 %v1033_v22, 0.0 }
 0x589   :  { %v1045_v27 = vpack.c.bf16 %v1039_v24, %v1038_v23 }
 0x58a   :  { %v1044_v28 = vpack.c.bf16 %v1037_v26, %v1036_v25 }
 0x58c   :  { %1294 = vmatprep.subr.bf16.mxu0 %v1044_v28 }
 0x58d   :  { %1295 = vmatpush3.bf16.msra.mxu0 %v1044_v28 }
 0x58e   :  { %1296 = vmatprep.subr.bf16.mxu0 %v1045_v27 }
 0x591   :  { %1297 = vmatpush3.bf16.msra.mxu0 %v1045_v27 }
 0x592   :  { %1302 = vmatprep.subr.bf16.mxu0 %v1405_v30 }
 0x594   :  { %1299 = vmatmul.mubr.msk.bf16.vlgmr.msra.gmra.mrb[24].mxu0 %vm86_vm0, %v1379_v29 }
 0x595   :  { %1306 = vmatprep.mubr.msk.bf16.mxu0 %vm1406_vm6, %v1405_v30 }
 0x667   :  { %v1300_v34 = vpop.f32.mrb[24].mxu0 }
 0x668   :  { %v1129_v35 = vadd.f32 %v1300_v34, %v1063_v33  ;;  %v1120_v36 = vpop.f32.mrb[25].mxu0 }
 0x669   :  { %v1121_v38 = vadd.f32 %v1120_v36, %v1053_v31  ;;  %v1301_v39 = vpop.f32.mrb[26].mxu0 }
 0x66a   :  { %v1132_v40 = vadd.f32 %v1301_v39, %v1068_v37  ;;  %v1123_v41 = vpop.f32.mrb[27].mxu0  ;;  %v1137_v43 = vmax.f32 %v1129_v35, 0.0 }
 0x66b   :  { %v1124_v42 = vadd.f32 %v1123_v41, %v1058_v32  ;;  %v1135_v45 = vmax.f32 %v1121_v38, 0.0 }
 0x66c   :  { %v1138_v44 = vmax.f32 %v1132_v40, 0.0 }
 0x66d   :  { %v1136_v46 = vmax.f32 %v1124_v42, 0.0 }
 0x66e   :  { %v1141_v47 = vpack.c.bf16 %v1138_v44, %v1137_v43 }
 0x66f   :  { %v1140_v48 = vpack.c.bf16 %v1136_v46, %v1135_v45 }
 0x671   :  { %1303 = vmatpush3.bf16.msra.mxu0 %v1140_v48 }
 0x672   :  { %1304 = vmatprep.subr.bf16.mxu0 %v1405_v30 }
 0x675   :  { %1305 = vmatpush3.bf16.msra.mxu0 %v1141_v47 }
 0x678   :  { %1307 = vmatmul.mubr.msk.bf16.vlgmr.msra.gmra.mrb[28].mxu0 %vm86_vm0, %v1139_v49 }
 0x74b   :  { %v1185_v51 = vpop.f32.mrb[28].mxu0 }
 0x74c   :  { %v1186_v52 = vadd.f32 %v1185_v51, %v1146_v50  ;;  %v1308_v53 = vpop.f32.mrb[29].mxu0 }
 0x74d   :  { %v1188_v54 = vpop.f32.mrb[30].mxu0 }
 0x74e   :  { %v1309_v55 = vpop.f32.mrb[31].mxu0  ;;  %1192 = vst.msk [vmem:[#allocation2] sm:$0xf] %vm1191_vm7, %v1186_v52 }
 0x74f   :  { %1391 = shalt.err (!%p1388_p4)
}
 0x750   :  { %s1392_s27 = scalar_lea.hbm %s1800_s18, 64 }
 0x751   :  { %p1393_p5 = scmp.ne.s32.totalorder %s1800_s18, %s1392_s27  ;;  %p1396_p6 = scmp.lt.u32.totalorder %s1392_s27, %s1800_s18 }
 0x753   :  { %p1398_p7 = pnand %p1396_p6, %p1393_p5 }
 0x755   :  { %1401 = shalt.err (!%p1398_p7)
}
 0x756   :  { %1202 = dma.vmem_to_hbm [thread:$0]  %s1200_s24, 64, %s1800_s18, [#allocation3]  }
 0x757   :  { %1402 = dma.done.wait [#allocation3], 64  }
 0x758   :  { %1403 = vsyncadd [#allocation3], 4294967232 }
 0x759   :  { %1206 = vsyncpa [#allocation3], 1 }

</bundles_post_ra>
